<compile_context>
chip_gen: v7x
topology: tpu7x:2x2x1
jax: 0.10.0
libtpu: 0.0.40
codegen_flags: <defaults>
</compile_context>

<pallas_src>
import functools

import jax
import jax.numpy as jnp
from jax.experimental import pallas as pl
from jax.experimental.pallas import tpu as pltpu


# ---------------------------------------------------------------------------
# Generation-aware VMEM sizing
# ---------------------------------------------------------------------------
def _vmem_capacity_bytes():
    """Physical VMEM per core (128 MiB v5e/v6e, 64 MiB v7x); safe fallback."""
    try:
        info = pltpu.get_tpu_info()
        cap = getattr(info, "vmem_capacity_bytes", None)
        if cap:
            return int(cap)
    except Exception:
        pass
    return 64 * 1024 * 1024  # conservative: correct on every generation


def _vmem_limit_bytes(cap):
    # ~75% of physical, capped at 100 MiB:
    #   v5e/v6e (128 MiB) -> 96 MiB,  v7x (64 MiB) -> 48 MiB.
    return int(min(cap * 3 // 4, 100 * 1024 * 1024))


def _with_vmem_guard(limit, required, cap):
    """If the chosen blocks need more than the default limit, raise it
    (best effort, capped below physical VMEM)."""
    if required > limit:
        limit = min(int(required * 1.1), cap * 9 // 10)
    return int(limit)


# ---------------------------------------------------------------------------
# Tile selection
# ---------------------------------------------------------------------------
def _pick_spatial_tile(HW):
    for c in (1024, 512, 256, 128):
        if HW % c == 0:
            return c
    return HW  # full (legal even if not a 128-multiple)


def _pick_batch_tile(B):
    cands = [c for c in (64, 32, 16, 8) if B % c == 0]
    # Prefer >= 2 grid steps along the parallel batch axis (megacore on v7x).
    for c in cands:
        if B // c >= 2:
            return c
    return cands[0] if cands else B


def _fused_batch_tile(B, C, HW, itemsize, slab_budget):
    """Largest batch tile whose full (tb, C, HW) slab fits the budget.
    Tiles < B automatically give >= 2 grid steps (megacore)."""
    slab = lambda tb: tb * C * HW * itemsize
    for c in (64, 32, 16, 8):
        if c < B and B % c == 0 and slab(c) <= slab_budget:
            return c
    if slab(B) <= slab_budget:
        return B
    return None


def _choose_gate_tiles(B, C, HW, itemsize, block_budget):
    tb = _pick_batch_tile(B)
    thw = _pick_spatial_tile(HW)
    # Shrink the spatial tile first (stays a 128-multiple divisor of HW) ...
    while tb * C * thw * itemsize > block_budget and thw % 256 == 0:
        thw //= 2
    # ... then the batch tile (stays a multiple of 8 dividing B, >= 8).
    while tb * C * thw * itemsize > block_budget and tb % 16 == 0:
        tb //= 2
    return tb, thw


def _choose_scale_tiles(B, C, HW, itemsize, block_budget):
    tb = _pick_batch_tile(B)
    thw = _pick_spatial_tile(HW)
    tc = C
    # Shrink channels first (tc stays a 128-multiple divisor of C) so the
    # spatial tile stays large and lane-dense ...
    while tb * tc * thw * itemsize > block_budget and tc % 256 == 0:
        tc //= 2
    # ... then the spatial tile, then the batch tile.
    while tb * tc * thw * itemsize > block_budget and thw % 256 == 0:
        thw //= 2
    while tb * tc * thw * itemsize > block_budget and tb % 16 == 0:
        tb //= 2
    return tb, tc, thw


# ---------------------------------------------------------------------------
# Kernel A (fused): slab-resident squeeze + excitation + scale  (1R + 1W)
# ---------------------------------------------------------------------------
def se_fused_kernel(x_ref, w1t_ref, w2t_ref, o_ref, *, inv_hw):
    x = x_ref[...]                                                # (tb, C, HW), VMEM-resident
    y = jnp.sum(x.astype(jnp.float32), axis=-1) * inv_hw          # spatial mean, (tb, C) f32
    h = jnp.dot(y, w1t_ref[...], preferred_element_type=jnp.float32)
    h = jnp.maximum(h, 0.0)                                       # ReLU
    g = jax.nn.sigmoid(jnp.dot(h, w2t_ref[...],
                               preferred_element_type=jnp.float32))
    # Multiply in the native input dtype (native bf16 VPU on v6e/v7x).
    o_ref[...] = (x * g.astype(x.dtype)[:, :, None]).astype(o_ref.dtype)


# ---------------------------------------------------------------------------
# Kernel B1 (two-pass): squeeze + excitation -> per-(b, c) gate
# ---------------------------------------------------------------------------
def se_gate_kernel(x_ref, w1t_ref, w2t_ref, g_ref, acc_ref, *, inv_hw):
    hw_i = pl.program_id(1)

    @pl.when(hw_i == 0)
    def _():
        acc_ref[...] = jnp.zeros_like(acc_ref)

    # Accumulate spatial sum for this HW tile: (tb, C, thw) -> (tb, C).
    acc_ref[...] += jnp.sum(x_ref[...].astype(jnp.float32), axis=-1)

    @pl.when(hw_i == pl.num_programs(1) - 1)
    def _():
        y = acc_ref[...] * inv_hw                                   # mean, (tb, C)
        h = jnp.dot(y, w1t_ref[...], preferred_element_type=jnp.float32)
        h = jnp.maximum(h, 0.0)                                     # ReLU
        s = jnp.dot(h, w2t_ref[...], preferred_element_type=jnp.float32)
        g_ref[...] = jax.nn.sigmoid(s)                              # (tb, C) f32


# ---------------------------------------------------------------------------
# Kernel B2 (two-pass): streaming scale  o = x * gate   (C-tiled, lane-dense)
# ---------------------------------------------------------------------------
def se_scale_kernel(g_ref, x_ref, o_ref):
    x = x_ref[...]                                                  # (tb, tc, thw), native dtype
    g = g_ref[...].astype(x.dtype)                                  # (tb, tc)
    o_ref[...] = (x * g[:, :, None]).astype(o_ref.dtype)


# ---------------------------------------------------------------------------
# Wrapper
# ---------------------------------------------------------------------------
def se_forward(x, w1, w2, *, force_two_pass=False):
    """x: (B, C, H, W). w1: (C//r, C), w2: (C, C//r). Returns (B, C, H, W)."""
    B, C, H, W = x.shape
    Cr = w1.shape[0]
    HW = H * W
    isz = jnp.dtype(x.dtype).itemsize

    x_flat = x.reshape(B, C, HW)
    w1t = jnp.transpose(w1)      # (C, Cr)  -> y @ w1t == y @ w1.T
    w2t = jnp.transpose(w2)      # (Cr, C)  -> h @ w2t == h @ w2.T
    w_bytes = 2 * (w1t.size * jnp.dtype(w1t.dtype).itemsize
                   + w2t.size * jnp.dtype(w2t.dtype).itemsize)

    cap = _vmem_capacity_bytes()
    vmem_limit = _vmem_limit_bytes(cap)

    # ---- fused single-pass path (x read once, written once) -----------------
    if not force_two_pass:
        slab_budget = vmem_limit // 5            # 2x in-buf + 2x out-buf + slack
        tb = _fused_batch_tile(B, C, HW, isz, slab_budget)
        if tb is not None:
            required = 4 * tb * C * HW * isz + w_bytes + (1 << 20)
            limit = _with_vmem_guard(vmem_limit, required, cap)
            out_flat = pl.pallas_call(
                functools.partial(se_fused_kernel, inv_hw=1.0 / HW),
                out_shape=jax.ShapeDtypeStruct((B, C, HW), x.dtype),
                grid_spec=pltpu.PrefetchScalarGridSpec(
                    num_scalar_prefetch=0,
                    grid=(B // tb,),
                    in_specs=[
                        pl.BlockSpec((tb, C, HW), lambda b: (b, 0, 0)),
                        pl.BlockSpec((C, Cr), lambda b: (0, 0)),
                        pl.BlockSpec((Cr, C), lambda b: (0, 0)),
                    ],
                    out_specs=pl.BlockSpec((tb, C, HW), lambda b: (b, 0, 0)),
                ),
                compiler_params=pltpu.CompilerParams(
                    dimension_semantics=("parallel",),
                    vmem_limit_bytes=limit),
            )(x_flat, w1t, w2t)
            return out_flat.reshape(B, C, H, W)

    # ---- two-pass fallback (per-batch slab too big for VMEM) -----------------
    block_budget = vmem_limit // 6               # ~16 MiB on v5e/v6e, ~8 MiB on v7x

    # pass 1: gates (B, C)
    tb_g, thw_g = _choose_gate_tiles(B, C, HW, isz, block_budget)
    req_gate = (2 * tb_g * C * thw_g * isz + 3 * tb_g * C * 4
                + w_bytes + (1 << 20))
    limit_g = _with_vmem_guard(vmem_limit, req_gate, cap)
    gates = pl.pallas_call(
        functools.partial(se_gate_kernel, inv_hw=1.0 / HW),
        out_shape=jax.ShapeDtypeStruct((B, C), jnp.float32),
        grid_spec=pltpu.PrefetchScalarGridSpec(
            num_scalar_prefetch=0,
            grid=(B // tb_g, HW // thw_g),
            in_specs=[
                pl.BlockSpec((tb_g, C, thw_g), lambda b, s: (b, 0, s)),
                pl.BlockSpec((C, Cr), lambda b, s: (0, 0)),
                pl.BlockSpec((Cr, C), lambda b, s: (0, 0)),
            ],
            out_specs=pl.BlockSpec((tb_g, C), lambda b, s: (b, 0)),
            scratch_shapes=[pltpu.VMEM((tb_g, C), jnp.float32)],
        ),
        compiler_params=pltpu.CompilerParams(
            dimension_semantics=("parallel", "arbitrary"),
            vmem_limit_bytes=limit_g),
    )(x_flat, w1t, w2t)

    # pass 2: lane-dense streaming scale, tiled over (B, C, HW), fully parallel
    tb_s, tc, thw_s = _choose_scale_tiles(B, C, HW, isz, block_budget)
    req_scale = 4 * tb_s * tc * thw_s * isz + 2 * tb_s * tc * 4 + (1 << 20)
    limit_s = _with_vmem_guard(vmem_limit, req_scale, cap)
    out_flat = pl.pallas_call(
        se_scale_kernel,
        out_shape=jax.ShapeDtypeStruct((B, C, HW), x.dtype),
        grid_spec=pltpu.PrefetchScalarGridSpec(
            num_scalar_prefetch=0,
            grid=(B // tb_s, C // tc, HW // thw_s),
            in_specs=[
                pl.BlockSpec((tb_s, tc), lambda b, c, s: (b, c)),
                pl.BlockSpec((tb_s, tc, thw_s), lambda b, c, s: (b, c, s)),
            ],
            out_specs=pl.BlockSpec((tb_s, tc, thw_s), lambda b, c, s: (b, c, s)),
        ),
        compiler_params=pltpu.CompilerParams(
            dimension_semantics=("parallel", "parallel", "parallel"),
            vmem_limit_bytes=limit_s),
    )(gates, x_flat)

    return out_flat.reshape(B, C, H, W)


# ---------------------------------------------------------------------------
# Pure-JAX reference (matches PyTorch SE.forward)
# ---------------------------------------------------------------------------
def se_reference(x, w1, w2):
    y = jnp.mean(x, axis=(2, 3))                 # AdaptiveAvgPool2d(1) + view
    y = jnp.maximum(y @ w1.T, 0.0)               # fc1 (no bias) + ReLU
    y = jax.nn.sigmoid(y @ w2.T)                 # fc2 (no bias) + Sigmoid
    return x * y[:, :, None, None]


if __name__ == "__main__":
    key = jax.random.PRNGKey(0)

    def run_case(B, C, H, W, ratio, k, force_two_pass=False):
        Cr = max(C // ratio, 1)
        kx, k1, k2 = jax.random.split(k, 3)
        x = jax.random.normal(kx, (B, C, H, W), dtype=jnp.float32)
        w1 = jax.random.normal(k1, (Cr, C), dtype=jnp.float32) * 0.5   # fc1.weight
        w2 = jax.random.normal(k2, (C, Cr), dtype=jnp.float32) * 0.5   # fc2.weight

        out = jax.block_until_ready(
            se_forward(x, w1, w2, force_two_pass=force_two_pass))
        ref = se_reference(x, w1, w2)
        assert out.shape == (B, C, H, W)
        assert jnp.allclose(out, ref, atol=1e-5, rtol=1e-5), "mismatch vs reference"

    ks = jax.random.split(key, 4)
    run_case(2, 4, 16, 16, 4, ks[0])                        # fused path, single grid step
    run_case(16, 8, 8, 16, 4, ks[1])                        # fused path, multi-step (tb=8)
    run_case(2, 4, 32, 64, 4, ks[2], force_two_pass=True)   # two-pass: HW accumulation
    run_case(8, 16, 8, 16, 4, ks[3], force_two_pass=True)   # two-pass: tb=8, scale C-grid

    print("KERNEL_OK")
</pallas_src>

<mosaic_0001>
module attributes {stable_mosaic.version = 11 : i64} {
  func.func @se_fused_kernel(%arg0: i32, %arg1: memref<2x4x256xf32, #tpu.memory_space<vmem>>, %arg2: memref<4x1xf32, #tpu.memory_space<vmem>>, %arg3: memref<1x4xf32, #tpu.memory_space<vmem>>, %arg4: memref<2x4x256xf32, #tpu.memory_space<vmem>>) attributes {dimension_semantics = [#tpu.dimension_semantics<parallel>], iteration_bounds = array<i64: 1>, scalar_prefetch = 0 : i64, scratch_operands = 0 : i64, tpu.core_type = #tpu.core_type<tc>, window_params = [{transform_indices = @transform_0, window_bounds = array<i64: 2, 4, 256>}, {pipeline_mode = #tpu.pipeline_mode<synchronous>, transform_indices = @transform_1, window_bounds = array<i64: 4, 1>}, {pipeline_mode = #tpu.pipeline_mode<synchronous>, transform_indices = @transform_2, window_bounds = array<i64: 1, 4>}, {transform_indices = @transform_3, window_bounds = array<i64: 2, 4, 256>}]} {
    %c0 = arith.constant 0 : index
    %c0_0 = arith.constant 0 : index
    %c0_1 = arith.constant 0 : index
    %0 = vector.load %arg1[%c0, %c0_0, %c0_1] : memref<2x4x256xf32, #tpu.memory_space<vmem>>, vector<2x4x256xf32>
    %cst = arith.constant dense<0.000000e+00> : vector<2x4xf32>
    %1 = vector.multi_reduction <add>, %0, %cst [2] : vector<2x4x256xf32> to vector<2x4xf32>
    %cst_2 = arith.constant 3.906250e-03 : f32
    %2 = vector.broadcast %cst_2 : f32 to vector<2x4xf32>
    %3 = arith.mulf %1, %2 : vector<2x4xf32>
    %c0_3 = arith.constant 0 : index
    %c0_4 = arith.constant 0 : index
    %4 = vector.load %arg2[%c0_3, %c0_4] : memref<4x1xf32, #tpu.memory_space<vmem>>, vector<4x1xf32>
    %cst_5 = arith.constant dense<0.000000e+00> : vector<2x1xf32>
    %5 = tpu.matmul %3, %4, %cst_5 {dimension_numbers = #tpu.dot_dimension_numbers<[1], [0], [0], [1], [0, 0, 1, 1], [], []>} : vector<2x4xf32>, vector<4x1xf32>, vector<2x1xf32> -> vector<2x1xf32>
    %cst_6 = arith.constant 0.000000e+00 : f32
    %6 = vector.broadcast %cst_6 : f32 to vector<2x1xf32>
    %7 = arith.maximumf %5, %6 : vector<2x1xf32>
    %c0_7 = arith.constant 0 : index
    %c0_8 = arith.constant 0 : index
    %8 = vector.load %arg3[%c0_7, %c0_8] : memref<1x4xf32, #tpu.memory_space<vmem>>, vector<1x4xf32>
    %cst_9 = arith.constant dense<0.000000e+00> : vector<2x4xf32>
    %9 = tpu.matmul %7, %8, %cst_9 {dimension_numbers = #tpu.dot_dimension_numbers<[1], [0], [0], [1], [0, 0, 1, 1], [], []>} : vector<2x1xf32>, vector<1x4xf32>, vector<2x4xf32> -> vector<2x4xf32>
    %10 = arith.negf %9 : vector<2x4xf32>
    %11 = math.exp %10 : vector<2x4xf32>
    %cst_10 = arith.constant 1.000000e+00 : f32
    %12 = vector.broadcast %cst_10 : f32 to vector<2x4xf32>
    %13 = arith.addf %12, %11 : vector<2x4xf32>
    %14 = arith.divf %12, %13 : vector<2x4xf32>
    %15 = vector.shape_cast %14 : vector<2x4xf32> to vector<2x4x1xf32>
    %16 = vector.broadcast %15 : vector<2x4x1xf32> to vector<2x4x256xf32>
    %17 = arith.mulf %0, %16 : vector<2x4x256xf32>
    %c0_11 = arith.constant 0 : index
    %c0_12 = arith.constant 0 : index
    %c0_13 = arith.constant 0 : index
    %18 = vector.load %arg4[%c0_11, %c0_12, %c0_13] : memref<2x4x256xf32, #tpu.memory_space<vmem>>, vector<2x4x256xf32>
    tpu.vector_store %arg4[%c0_11, %c0_12, %c0_13], %17 {strides = array<i32>} : memref<2x4x256xf32, #tpu.memory_space<vmem>>, vector<2x4x256xf32>,
    return
  }
  func.func @transform_0(%arg0: i32) -> (i32, i32, i32) {
    %c0_i32 = arith.constant 0 : i32
    %c0_i32_0 = arith.constant 0 : i32
    %c0_i32_1 = arith.constant 0 : i32
    return %arg0, %c0_i32, %c0_i32_0 : i32, i32, i32
  }
  func.func @transform_1(%arg0: i32) -> (i32, i32) {
    %c0_i32 = arith.constant 0 : i32
    %c0_i32_0 = arith.constant 0 : i32
    %c0_i32_1 = arith.constant 0 : i32
    return %c0_i32, %c0_i32_0 : i32, i32
  }
  func.func @transform_2(%arg0: i32) -> (i32, i32) {
    %c0_i32 = arith.constant 0 : i32
    %c0_i32_0 = arith.constant 0 : i32
    %c0_i32_1 = arith.constant 0 : i32
    return %c0_i32, %c0_i32_0 : i32, i32
  }
  func.func @transform_3(%arg0: i32) -> (i32, i32, i32) {
    %c0_i32 = arith.constant 0 : i32
    %c0_i32_0 = arith.constant 0 : i32
    %c0_i32_1 = arith.constant 0 : i32
    return %arg0, %c0_i32, %c0_i32_0 : i32, i32, i32
  }
}

</mosaic_0001>

<bundles_post_ra>
// kernel: tpu_custom_call.1
= control target key start
LH: loop header
LB: loop body
LE: loop exit
PB: predicated region body
PF: predicated region fallthrough
CT: control target
= control target key end

     0   :  { %8 = vsyncpa [#allocation3], 0  ;;  %s434_s0 = inlined_call_operand.hbm [shape: f32[2,4,256], index: 0, kind: input, shape index: {}]   ;;  %s435_s1 = inlined_call_operand.vmem [shape: f32[4,1], index: 1, kind: input, shape index: {}]   ;;  %s436_s2 = inlined_call_operand.vmem [shape: f32[1,4], index: 2, kind: input, shape index: {}]   ;;  %s437_s3 = inlined_call_operand.hbm [shape: f32[2,4,256], index: 3, kind: output, shape index: {}]  }
   0x1   :  { %9 = vsyncpa [#allocation4], 0  ;;  %s360_s12 = smov [#allocation2]   ;;  %s312_s16 = scalar_lea.hbm %s434_s0, 256 }
   0x2   :  { %s15_s13 = sshll.u32 %s360_s12, 4  ;;  %p313_p0 = scmp.ne.s32.totalorder %s434_s0, %s312_s16  ;;  %s16_s13 = int_to_ptr.vmem [resolvable:$true] %s15_s13 }
   0x3   :  { %p316_p1 = scmp.lt.u32.totalorder %s312_s16, %s434_s0 }
   0x5   :  { %p318_p2 = pnand %p316_p1, %p313_p0 }
   0x7   :  { %321 = shalt.err (!%p318_p2)
}
   0x8   :  { %s322_s21 = scalar_lea.vmem %s16_s13, 256  ;;  %p327_p4 = scmp.lt.s32.totalorder %s16_s13, %s16_s13 }
   0x9   :  { %p323_p3 = scmp.ne.s32.totalorder %s16_s13, %s322_s21  ;;  %p328_p5 = scmp.lt.s32.totalorder %s322_s21, %s322_s21 }
   0xb   :  { %p329_p6 = por %p328_p5, %p327_p4 }
   0xd   :  { %p330_p7 = pnand %p329_p6, %p323_p3 }
   0xf   :  { %333 = shalt.err (!%p330_p7)
}
  0x10   :  { %s361_s22 = smov 128   ;;  %s362_s23 = smov 8  }
  0x11   :  { %21 = dma.hbm_to_vmem [thread:$0]  %s434_s0, 256, %s16_s13, [#allocation3], %s361_s22, %s361_s22, %s362_s23  }
  0x12   :  { %356 = dma.done.wait [#allocation3], 256  }
  0x13   :  { %357 = vsyncadd [#allocation3], 4294967040  ;;  %vm37_vm0 = vcmask 1043456   ;;  %v29_v0 = vld [vmem:[#allocation2] sm:$0xff]  ;;  %v402_v1 = vld [vmem:[#allocation2 + $0x8] sm:$0xff]  ;;  %v363_v11 = vmov 0.0   ;;  %v53_v12 = vlaneseq }
  0x14   :  { %v33_v2 = vcombine.high %v29_v0, %v29_v0  ;;  %v38_v3 = vsel %vm37_vm0, %v29_v0, 0.0  ;;  %v34_v4 = vcombine.high %v402_v1, %v402_v1  ;;  %v43_v6 = vsel %vm37_vm0, %v402_v1, 0.0  ;;  %v50_v10 = vld [vmem:[%s435_s1] sm:$0xf]  ;;  %289 = vmatprep.subr.mxu0 %v363_v11  ;;  %294 = vmatprep.subr.mxu1 %v363_v11 }
  0x15   :  { %vm364_vm1 = vmmov 0   ;;  %290 = vmatpush3.msk.msra.mxu0 %vm37_vm0, %v50_v10  ;;  %v54_v13 = vand.u32 127, %v53_v12  ;;  %v56_v14 = vshrl.u32 %v53_v12, 7  ;;  %vm63_vm2 = vcmask 1041409   ;;  %v142_v23 = vld [vmem:[%s436_s2] sm:$0x1] }
  0x16   :  { %v39_v5 = vsel %vm37_vm0, %v33_v2, 0.0  ;;  %v44_v7 = vsel %vm37_vm0, %v34_v4, 0.0  ;;  %291 = vmatprep.mubr.msk.f32.mxu0 %vm364_vm1, %v363_v11  ;;  %296 = vmatprep.mubr.msk.f32.mxu1 %vm364_vm1, %v363_v11  ;;  %vm65_vm3 = vcmask 31744   ;;  %vm147_vm4 = vcmask 1040384   ;;  %s366_s2 = smov [#allocation5]  }
  0x17   :  { %v40_v8 = vadd.f32 %v39_v5, %v38_v3  ;;  %v45_v9 = vadd.f32 %v44_v7, %v43_v6  ;;  %v57_v16 = vsub.s32 %v54_v13, %v56_v14  ;;  %295 = vmatpush3.msk.msra.mxu1 %vm147_vm4, %v142_v23  ;;  %vm143_vm5 = vcmask 7168   ;;  %s268_s28 = sshll.u32 %s366_s2, 4  ;;  %s269_s28 = int_to_ptr.vmem [resolvable:$true] %s268_s28 }
  0x18   :  { %v229_v32 = vsub.s32 0, %v56_v14  ;;  %v236_v35 = vsub.s32 1, %v56_v14  ;;  %v365_v37 = vmov 839922192   ;;  %s334_s29 = scalar_lea.vmem %s269_s28, 256  ;;  %p339_p9 = scmp.lt.s32.totalorder %s269_s28, %s269_s28 }
  0x19   :  { %41 = vadd.xlane.f32.xlu0 %v40_v8  ;;  %v244_v38 = vunpack.c.l.s4 %v365_v37  ;;  %p335_p8 = scmp.ne.s32.totalorder %s269_s28, %s334_s29  ;;  %p340_p10 = scmp.lt.s32.totalorder %s334_s29, %s334_s29 }
  0x1b   :  { %v245_v39 = vunpack.c.0.s8 %v244_v38  ;;  %p341_p11 = por %p340_p10, %p339_p9 }
  0x1d   :  { %46 = vadd.xlane.f32.xlu0 %v45_v9  ;;  %v248_v40 = vsub.s32 %v245_v39, %v56_v14  ;;  %p342_p12 = pnand %p341_p11, %p335_p8 }
  0xa6   :  { %v42_v15 = vpop.xlane.xlu0 %41 }
  0xa7   :  { %v48_v17 = vmul.f32 0.00390625, %v42_v15 }
  0xa9   :  { %v58_v20 = vrot.slane %v48_v17, %v57_v16 }
  0xaa   :  { %v47_v18 = vpop.xlane.xlu0 %46 }
  0xab   :  { %v49_v19 = vmul.f32 0.00390625, %v47_v18 }
  0xad   :  { %v62_v21 = vrot.slane %v49_v19, %v57_v16 }
  0xaf   :  { %v64_v22 = vsel %vm63_vm2, %v62_v21, %v58_v20 }
  0xb0   :  { %292 = vmatmul.mubr.msk.f32.vlgmr.msra.gmra.mrb[0].mxu0 %vm65_vm3, %v64_v22 }
 0x183   :  { %v137_v24 = vpop.f32.mrb[0].mxu0 }
 0x184   :  { %v141_v25 = vmax.f32 %v137_v24, 0.0  ;;  %v293_v26 = vpop.f32.mrb[1].mxu0 }
 0x186   :  { %297 = vmatmul.mubr.msk.f32.vlgmr.msra.gmra.mrb[0].mxu1 %vm143_vm5, %v141_v25 }
 0x259   :  { %v217_v27 = vpop.f32.mrb[0].mxu1 }
 0x25a   :  { %v284_v28 = vmul.f32 -1.442695, %v217_v27  ;;  %v298_v29 = vpop.f32.mrb[1].mxu1 }
 0x25c   :  { %308 = vpow2.f32 %v284_v28 }
 0x266   :  { %v309_v30 = vpop.eup %308 }
 0x267   :  { %v224_v31 = vadd.f32 1.0, %v309_v30 }
 0x269   :  { %310 = vrcp.f32 %v224_v31 }
 0x273   :  { %v311_v33 = vpop.eup %310 }
 0x274   :  { %v230_v34 = vrot.slane %v311_v33, %v229_v32  ;;  %v237_v36 = vrot.slane %v311_v33, %v236_v35 }
 0x276   :  { %232 = vbcast.lane.b32.xlu1 %v230_v34, 256 }
 0x27a   :  { %239 = vbcast.lane.b32.xlu1 %v237_v36, 256 }
 0x2e8   :  { %v233_v41 = vpop.permute.xlu1 %232 }
 0x2e9   :  { %v249_v42 = vrot.slane %v233_v41, %v248_v40 }
 0x2eb   :  { %v259_v43 = vmul.f32 %v249_v42, %v29_v0 }
 0x2ec   :  { %v240_v44 = vpop.permute.xlu1 %239 }
 0x2ed   :  { %261 = vst [vmem:[#allocation5] sm:$0xff] %v259_v43  ;;  %v256_v45 = vrot.slane %v240_v44, %v248_v40 }
 0x2ef   :  { %v260_v46 = vmul.f32 %v256_v45, %v402_v1 }
 0x2f1   :  { %262 = vst [vmem:[#allocation5 + $0x8] sm:$0xff] %v260_v46 }
 0x2f2   :  { %345 = shalt.err (!%p342_p12)
}
 0x2f3   :  { %s346_s5 = scalar_lea.hbm %s437_s3, 256 }
 0x2f4   :  { %p347_p13 = scmp.ne.s32.totalorder %s437_s3, %s346_s5  ;;  %p350_p0 = scmp.lt.u32.totalorder %s346_s5, %s437_s3 }
 0x2f6   :  { %p352_p1 = pnand %p350_p0, %p347_p13 }
 0x2f8   :  { %355 = shalt.err (!%p352_p1)
}
 0x2f9   :  { %274 = dma.vmem_to_hbm [thread:$0]  %s269_s28, 256, %s437_s3, [#allocation4], %s361_s22, %s361_s22, %s362_s23  }
 0x2fa   :  { %358 = dma.done.wait [#allocation4], 256  }
 0x2fb   :  { %359 = vsyncadd [#allocation4], 4294967040 }
 0x2fc   :  { %278 = vsyncpa [#allocation3], 1 }
 0x2fd   :  { %279 = vsyncpa [#allocation4], 1 }

</bundles_post_ra>
